<compile_context>
chip_gen: v7x
topology: tpu7x:2x2x1
jax: 0.10.0
libtpu: 0.0.40
codegen_flags: <defaults>
</compile_context>

<pallas_src>
import functools
import math

import jax
import jax.numpy as jnp
from jax.experimental import pallas as pl
from jax.experimental.pallas import tpu as pltpu

_VOCAB = 257
_VOCAB_PAD = 384        # pad the LUT to 3 full lane-vregs
_EMB = 8
_COUT = 128
_BN_EPS = 1e-5


# ----------------------------- kernel bodies --------------------------------

def _gated_conv_blockmax(slab, w1, w2, b1, b2, b_blk, t_blk):
    """slab: (b_blk*t_blk, 8*W) bf16, channel-major columns [c*W + k]."""
    k4 = w1.shape[0]                                        # = 4*W
    h1 = jnp.dot(slab[:, :k4], w1, preferred_element_type=jnp.float32) + b1
    h2 = jnp.dot(slab[:, k4:], w2, preferred_element_type=jnp.float32) + b2
    gated = h1 * jax.nn.sigmoid(h2)                         # (M, 128) f32
    # Partial MaxPool over this temporal tile (sublane reduction on the XLU).
    return jnp.max(gated.reshape(b_blk, t_blk, _COUT), axis=1)   # (b_blk, 128)


def _embed_slab(tbl_ref, tok):
    """In-kernel embedding lookup, channel-major.

    tbl_ref: (8, _VOCAB_PAD) f32 transposed embedding table (VMEM resident).
    tok:     (M, W) int32 token ids in [0, 257).
    returns  (M, 8*W) bf16 slab with slab[m, c*W + k] = embed[tok[m, k], c].
    """
    cols = [jnp.take(tbl_ref[c, :], tok, axis=0, mode="clip") for c in range(_EMB)]
    return jnp.concatenate(cols, axis=-1).astype(jnp.bfloat16)


def _malconv_token_kernel(tok_ref, tbl_ref, w1_ref, w2_ref, b1_ref, b2_ref, out_ref):
    ti = pl.program_id(2)
    b_blk, t_blk, w = tok_ref.shape
    tok = tok_ref[...].reshape(b_blk * t_blk, w)
    slab = _embed_slab(tbl_ref, tok)
    blk_max = _gated_conv_blockmax(slab, w1_ref[...], w2_ref[...],
                                   b1_ref[...], b2_ref[...], b_blk, t_blk)

    @pl.when(ti == 0)
    def _init():
        out_ref[0] = blk_max

    @pl.when(ti != 0)
    def _accum():
        out_ref[0] = jnp.maximum(out_ref[0], blk_max)


def _malconv_slab_kernel(slab_ref, w1_ref, w2_ref, b1_ref, b2_ref, out_ref):
    ti = pl.program_id(2)
    b_blk, t_blk, w8 = slab_ref.shape
    slab = slab_ref[...].reshape(b_blk * t_blk, w8)
    blk_max = _gated_conv_blockmax(slab, w1_ref[...], w2_ref[...],
                                   b1_ref[...], b2_ref[...], b_blk, t_blk)

    @pl.when(ti == 0)
    def _init():
        out_ref[0] = blk_max

    @pl.when(ti != 0)
    def _accum():
        out_ref[0] = jnp.maximum(out_ref[0], blk_max)


# --------------------------- capability probe --------------------------------

@functools.lru_cache(maxsize=None)
def _in_kernel_gather_supported():
    """True iff the in-kernel LUT gather path lowers and is numerically correct."""
    def probe(tbl_ref, idx_ref, o_ref):
        o_ref[...] = _embed_slab(tbl_ref, idx_ref[...]).astype(jnp.float32)

    try:
        tbl = (0.01 * jnp.arange(_EMB * _VOCAB_PAD, dtype=jnp.float32)
               ).reshape(_EMB, _VOCAB_PAD)
        idx = ((jnp.arange(16 * 128, dtype=jnp.int32) * 7) % _VOCAB).reshape(16, 128)
        fn = jax.jit(pl.pallas_call(
            probe, out_shape=jax.ShapeDtypeStruct((16, _EMB * 128), jnp.float32)))
        out = jax.block_until_ready(fn(tbl, idx))
        ref = jnp.concatenate([tbl[c][idx] for c in range(_EMB)], axis=-1)
        ref = ref.astype(jnp.bfloat16).astype(jnp.float32)
        return bool(jnp.allclose(out, ref, rtol=1e-6, atol=1e-6))
    except Exception:
        # Mosaic does not lower this gather pattern here -> wrapper-gather fallback.
        return False


# ----------------------------- tiling helpers --------------------------------

def _device_budgets():
    """(activation-block budget bytes, vmem_limit_bytes or None) per generation."""
    try:
        kind = jax.devices()[0].device_kind.lower()
    except Exception:
        kind = ""
    if "v7" in kind:          # 64 MiB physical VMEM: leave compiler headroom
        return 8 << 20, 40 << 20
    if "v5" in kind:          # 16 MiB default scoped; raise it modestly
        return 6 << 20, 48 << 20
    if "v6" in kind:          # 128 MiB physical: amortize per-step overhead
        return 16 << 20, 80 << 20
    return 6 << 20, None


def _pick_b_block(B):
    # Keep the (b_blk, 128) output block either full-B or a multiple of 8 sublanes.
    return B if (B <= 8 or B % 8) else 8


def _pick_t_block(T, per_window_bytes, budget):
    # Largest divisor of T that is a multiple of 16 (bf16 sublane tiling) or T
    # itself, whose working set fits the budget.  Never decrement-by-1.
    cands = set()
    for d in range(1, math.isqrt(T) + 1):
        if T % d == 0:
            cands.update((d, T // d))
    valid = sorted(t for t in cands if t % 16 == 0 or t == T)
    fitting = [t for t in valid if t * per_window_bytes <= budget]
    return max(fitting) if fitting else min(valid)


def _tok_index_map(n_ti):
    def imap(to, bi, ti):
        return (bi, to * n_ti + ti, 0)
    return imap


def _const_spec(shape):
    def imap(to, bi, ti):
        return (0,) * len(shape)
    return pl.BlockSpec(shape, imap)


# ------------------------------ host wrapper ----------------------------------

def malconv_forward(tokens, params, *, window_size, in_kernel_gather=None):
    """MalConv forward (eval-mode BatchNorm). tokens: (B, L) int32 in [0, 257)."""
    B, L = tokens.shape
    W = window_size
    T = L // W
    K4 = 4 * W
    assert T * W == L, "input length must be a multiple of window_size"

    if in_kernel_gather is None:
        in_kernel_gather = _in_kernel_gather_supported()

    # ---- fold BatchNorm (eval) + biases into the conv_1 weights ----
    scale = params["bn_gamma"] / jnp.sqrt(params["bn_var"] + _BN_EPS)
    shift = params["bn_beta"] - params["bn_mean"] * scale
    # channel-major flattening: row index = c*W + k (matches the in-kernel slab)
    w1f = jnp.transpose(params["conv1_w"], (1, 2, 0)).reshape(K4, _COUT)
    w1f = (w1f * scale[None, :]).astype(jnp.bfloat16)
    w2f = jnp.transpose(params["conv2_w"], (1, 2, 0)).reshape(K4, _COUT).astype(jnp.bfloat16)
    b1 = (params["conv1_b"] * scale + shift).reshape(1, _COUT).astype(jnp.float32)
    b2 = params["conv2_b"].reshape(1, _COUT).astype(jnp.float32)

    act_budget, vmem_limit = _device_budgets()
    b_blk = _pick_b_block(B)
    if in_kernel_gather:
        # int32 tokens x2 pipeline buffers + f32 gather temporaries + bf16 slab.
        per_window = b_blk * W * (2 * 4 + 8 * 4 + 8 * 2)
    else:
        # bf16 slab x2 pipeline buffers + slack for the matmul temporaries.
        per_window = b_blk * W * (2 * 8 * 2 + 8)
    t_blk = _pick_t_block(T, per_window, act_budget)
    n_ti_total = T // t_blk
    n_b = B // b_blk

    # Split the long temporal axis across a second "parallel" grid dim so a
    # 2-TensorCore chip (v7x) is not idle when the batch axis is tiny.
    n_to = 2 if (n_b < 2 and n_ti_total % 2 == 0) else 1
    n_ti = n_ti_total // n_to

    out_spec = pl.BlockSpec((1, b_blk, _COUT), lambda to, bi, ti: (to, bi, 0))
    flops = 4 * B * T * W * 4 * _COUT                 # two stride-W convs
    transcendentals = B * T * _COUT                   # sigmoid gate
    weight_bytes = 2 * K4 * _COUT * 2 + 2 * _COUT * 4

    cparams = dict(dimension_semantics=("parallel", "parallel", "arbitrary"))
    if vmem_limit is not None:
        cparams["vmem_limit_bytes"] = vmem_limit

    if in_kernel_gather:
        tok3 = tokens.reshape(B, T, W).astype(jnp.int32)
        tblT = jnp.zeros((_EMB, _VOCAB_PAD), jnp.float32)
        tblT = tblT.at[:, :_VOCAB].set(params["embed"].T.astype(jnp.float32))
        cost = pl.CostEstimate(
            flops=int(flops), transcendentals=int(transcendentals),
            bytes_accessed=int(tok3.size * 4 + tblT.size * 4 + weight_bytes
                               + n_to * B * _COUT * 4))
        pooled_parts = pl.pallas_call(
            _malconv_token_kernel,
            out_shape=jax.ShapeDtypeStruct((n_to, B, _COUT), jnp.float32),
            grid=(n_to, n_b, n_ti),
            in_specs=[
                pl.BlockSpec((b_blk, t_blk, W), _tok_index_map(n_ti)),   # tokens
                _const_spec((_EMB, _VOCAB_PAD)),                         # embed LUT
                _const_spec((K4, _COUT)), _const_spec((K4, _COUT)),      # conv weights
                _const_spec((1, _COUT)), _const_spec((1, _COUT)),        # biases
            ],
            out_specs=out_spec,
            compiler_params=pltpu.CompilerParams(**cparams),
            cost_estimate=cost,
        )(tok3, tblT, w1f, w2f, b1, b2)
    else:
        # Fallback: gather in the wrapper (XLA) into ONE channel-major bf16 slab.
        emb = params["embed"].astype(jnp.bfloat16)[tokens]               # (B, L, 8)
        slab = jnp.transpose(emb.reshape(B, T, W, _EMB), (0, 1, 3, 2)).reshape(B, T, 8 * W)
        cost = pl.CostEstimate(
            flops=int(flops), transcendentals=int(transcendentals),
            bytes_accessed=int(slab.size * 2 + weight_bytes + n_to * B * _COUT * 4))
        pooled_parts = pl.pallas_call(
            _malconv_slab_kernel,
            out_shape=jax.ShapeDtypeStruct((n_to, B, _COUT), jnp.float32),
            grid=(n_to, n_b, n_ti),
            in_specs=[
                pl.BlockSpec((b_blk, t_blk, 8 * W), _tok_index_map(n_ti)),
                _const_spec((K4, _COUT)), _const_spec((K4, _COUT)),
                _const_spec((1, _COUT)), _const_spec((1, _COUT)),
            ],
            out_specs=out_spec,
            compiler_params=pltpu.CompilerParams(**cparams),
            cost_estimate=cost,
        )(slab, w1f, w2f, b1, b2)

    pooled = jnp.max(pooled_parts, axis=0)            # (B, 128) across temporal splits

    # ---- tiny FC tail (one small matmul each; not worth a kernel) ----
    z = pooled @ params["fc1_w"] + params["fc1_b"]
    z = z * scale + shift                             # module reuses the same BatchNorm1d
    logits = z @ params["fc2_w"] + params["fc2_b"]    # (B, 1)
    return logits


# ------------------------------- reference -----------------------------------

def malconv_reference(tokens, params, *, window_size):
    """Pure-JAX mirror of the PyTorch forward (eval-mode BatchNorm)."""
    B, L = tokens.shape
    W = window_size
    T = L // W
    emb = params["embed"][tokens]                    # (B, L, 8)
    xw = emb.reshape(B, T, W, 8)
    c1 = jnp.einsum("btkc,ock->bto", xw[..., :4], params["conv1_w"]) + params["conv1_b"]
    scale = params["bn_gamma"] / jnp.sqrt(params["bn_var"] + _BN_EPS)
    shift = params["bn_beta"] - params["bn_mean"] * scale
    c1 = c1 * scale + shift
    g = jax.nn.sigmoid(
        jnp.einsum("btkc,ock->bto", xw[..., 4:], params["conv2_w"]) + params["conv2_b"])
    x = c1 * g                                       # (B, T, 128)
    x = jnp.max(x, axis=1)                           # MaxPool1d over T -> (B, 128)
    x = x @ params["fc1_w"] + params["fc1_b"]
    x = x * scale + shift
    x = x @ params["fc2_w"] + params["fc2_b"]        # (B, 1)
    return x


def init_params(key, window_size):
    W = window_size
    ks = jax.random.split(key, 8)
    embed = 0.1 * jax.random.normal(ks[0], (257, 8), jnp.float32)
    embed = embed.at[0].set(0.0)                     # padding_idx=0
    return dict(
        embed=embed,
        conv1_w=0.05 * jax.random.normal(ks[1], (128, 4, W), jnp.float32),
        conv1_b=0.05 * jax.random.normal(ks[2], (128,), jnp.float32),
        conv2_w=0.05 * jax.random.normal(ks[3], (128, 4, W), jnp.float32),
        conv2_b=0.05 * jax.random.normal(ks[4], (128,), jnp.float32),
        bn_gamma=jnp.ones((128,), jnp.float32),
        bn_beta=jnp.zeros((128,), jnp.float32),
        bn_mean=jnp.zeros((128,), jnp.float32),
        bn_var=jnp.ones((128,), jnp.float32),
        fc1_w=0.05 * jax.random.normal(ks[5], (128, 128), jnp.float32),  # in x out
        fc1_b=0.05 * jax.random.normal(ks[6], (128,), jnp.float32),
        fc2_w=0.05 * jax.random.normal(ks[7], (128, 1), jnp.float32),    # in x out
        fc2_b=jnp.zeros((1,), jnp.float32),
    )


if __name__ == "__main__":
    # Small shapes: input_length=2048, window_size=128 -> T = 16 conv windows.
    B, L, W = 4, 2048, 128
    key = jax.random.PRNGKey(0)
    pkey, tkey = jax.random.split(key)
    params = init_params(pkey, W)
    tokens = jax.random.randint(tkey, (B, L), 0, 257, dtype=jnp.int32)

    use_gather = _in_kernel_gather_supported()       # probe once, outside jit
    fwd = jax.jit(functools.partial(malconv_forward, window_size=W,
                                    in_kernel_gather=use_gather))
    out = jax.block_until_ready(fwd(tokens, params))

    ref = malconv_reference(tokens, params, window_size=W)
    assert out.shape == (B, 1), out.shape
    assert jnp.allclose(out, ref, rtol=1e-2, atol=1e-2), (out, ref)
    print("KERNEL_OK")
</pallas_src>

<mosaic_0001>
module attributes {stable_mosaic.version = 11 : i64} {
  func.func @_malconv_slab_kernel(%arg0: i32, %arg1: i32, %arg2: i32, %arg3: memref<4x16x1024xbf16, #tpu.memory_space<vmem>>, %arg4: memref<512x128xbf16, #tpu.memory_space<vmem>>, %arg5: memref<512x128xbf16, #tpu.memory_space<vmem>>, %arg6: memref<1x128xf32, #tpu.memory_space<vmem>>, %arg7: memref<1x128xf32, #tpu.memory_space<vmem>>, %arg8: memref<1x4x128xf32, #tpu.memory_space<vmem>>) attributes {dimension_semantics = [#tpu.dimension_semantics<parallel>, #tpu.dimension_semantics<parallel>, #tpu.dimension_semantics<arbitrary>], iteration_bounds = array<i64: 1, 1, 1>, scalar_prefetch = 0 : i64, scratch_operands = 0 : i64, tpu.core_type = #tpu.core_type<tc>, window_params = [{transform_indices = @transform_0, window_bounds = array<i64: 4, 16, 1024>}, {pipeline_mode = #tpu.pipeline_mode<synchronous>, transform_indices = @transform_1, window_bounds = array<i64: 512, 128>}, {pipeline_mode = #tpu.pipeline_mode<synchronous>, transform_indices = @transform_2, window_bounds = array<i64: 512, 128>}, {pipeline_mode = #tpu.pipeline_mode<synchronous>, transform_indices = @transform_3, window_bounds = array<i64: 1, 128>}, {pipeline_mode = #tpu.pipeline_mode<synchronous>, transform_indices = @transform_4, window_bounds = array<i64: 1, 128>}, {transform_indices = @transform_5, window_bounds = array<i64: 1, 4, 128>}]} {
    %c0 = arith.constant 0 : index
    %c0_0 = arith.constant 0 : index
    %c0_1 = arith.constant 0 : index
    %0 = vector.load %arg3[%c0, %c0_0, %c0_1] : memref<4x16x1024xbf16, #tpu.memory_space<vmem>>, vector<4x16x1024xbf16>
    %1 = vector.shape_cast %0 : vector<4x16x1024xbf16> to vector<64x1024xbf16>
    %c0_2 = arith.constant 0 : index
    %c0_3 = arith.constant 0 : index
    %2 = vector.load %arg4[%c0_2, %c0_3] : memref<512x128xbf16, #tpu.memory_space<vmem>>, vector<512x128xbf16>
    %c0_4 = arith.constant 0 : index
    %c0_5 = arith.constant 0 : index
    %3 = vector.load %arg5[%c0_4, %c0_5] : memref<512x128xbf16, #tpu.memory_space<vmem>>, vector<512x128xbf16>
    %c0_6 = arith.constant 0 : index
    %c0_7 = arith.constant 0 : index
    %4 = vector.load %arg6[%c0_6, %c0_7] : memref<1x128xf32, #tpu.memory_space<vmem>>, vector<1x128xf32>
    %c0_8 = arith.constant 0 : index
    %c0_9 = arith.constant 0 : index
    %5 = vector.load %arg7[%c0_8, %c0_9] : memref<1x128xf32, #tpu.memory_space<vmem>>, vector<1x128xf32>
    %6 = vector.extract_strided_slice %1 {offsets = [0, 0], sizes = [64, 512], strides = [1, 1]} : vector<64x1024xbf16> to vector<64x512xbf16>
    %cst = arith.constant dense<0.000000e+00> : vector<64x128xf32>
    %7 = tpu.matmul %6, %2, %cst {dimension_numbers = #tpu.dot_dimension_numbers<[1], [0], [0], [1], [0, 0, 1, 1], [], []>} : vector<64x512xbf16>, vector<512x128xbf16>, vector<64x128xf32> -> vector<64x128xf32>
    %8 = vector.broadcast %4 : vector<1x128xf32> to vector<64x128xf32>
    %9 = arith.addf %7, %8 : vector<64x128xf32>
    %10 = vector.extract_strided_slice %1 {offsets = [0, 512], sizes = [64, 512], strides = [1, 1]} : vector<64x1024xbf16> to vector<64x512xbf16>
    %cst_10 = arith.constant dense<0.000000e+00> : vector<64x128xf32>
    %11 = tpu.matmul %10, %3, %cst_10 {dimension_numbers = #tpu.dot_dimension_numbers<[1], [0], [0], [1], [0, 0, 1, 1], [], []>} : vector<64x512xbf16>, vector<512x128xbf16>, vector<64x128xf32> -> vector<64x128xf32>
    %12 = vector.broadcast %5 : vector<1x128xf32> to vector<64x128xf32>
    %13 = arith.addf %11, %12 : vector<64x128xf32>
    %14 = arith.negf %13 : vector<64x128xf32>
    %15 = math.exp %14 : vector<64x128xf32>
    %cst_11 = arith.constant 1.000000e+00 : f32
    %16 = vector.broadcast %cst_11 : f32 to vector<64x128xf32>
    %17 = arith.addf %16, %15 : vector<64x128xf32>
    %18 = arith.divf %16, %17 : vector<64x128xf32>
    %19 = arith.mulf %9, %18 : vector<64x128xf32>
    %20 = vector.shape_cast %19 : vector<64x128xf32> to vector<4x16x128xf32>
    %cst_12 = arith.constant dense<0xFF800000> : vector<4x128xf32>
    %21 = vector.multi_reduction <maximumf>, %20, %cst_12 [1] : vector<4x16x128xf32> to vector<4x128xf32>
    %c0_i32 = arith.constant 0 : i32
    %22 = arith.cmpi eq, %arg2, %c0_i32 : i32
    %23 = arith.extui %22 : i1 to i32
    %c0_i32_13 = arith.constant 0 : i32
    %24 = arith.cmpi ne, %23, %c0_i32_13 : i32
    scf.if %24 {
      %c0_16 = arith.constant 0 : index
      %c0_17 = arith.constant 0 : index
      %c0_18 = arith.constant 0 : index
      %28 = vector.load %arg8[%c0_16, %c0_17, %c0_18] : memref<1x4x128xf32, #tpu.memory_space<vmem>>, vector<1x4x128xf32>
      %29 = vector.shape_cast %28 : vector<1x4x128xf32> to vector<4x128xf32>
      %30 = vector.shape_cast %21 : vector<4x128xf32> to vector<1x4x128xf32>
      tpu.vector_store %arg8[%c0_16, %c0_17, %c0_18], %30 {strides = array<i32>} : memref<1x4x128xf32, #tpu.memory_space<vmem>>, vector<1x4x128xf32>,
    } else {
    }
    %c0_i32_14 = arith.constant 0 : i32
    %25 = arith.cmpi ne, %arg2, %c0_i32_14 : i32
    %26 = arith.extui %25 : i1 to i32
    %c0_i32_15 = arith.constant 0 : i32
    %27 = arith.cmpi ne, %26, %c0_i32_15 : i32
    scf.if %27 {
      %c0_16 = arith.constant 0 : index
      %c0_17 = arith.constant 0 : index
      %c0_18 = arith.constant 0 : index
      %28 = vector.load %arg8[%c0_16, %c0_17, %c0_18] : memref<1x4x128xf32, #tpu.memory_space<vmem>>, vector<1x4x128xf32>
      %29 = vector.shape_cast %28 : vector<1x4x128xf32> to vector<4x128xf32>
      %30 = arith.maximumf %29, %21 : vector<4x128xf32>
      %c0_19 = arith.constant 0 : index
      %c0_20 = arith.constant 0 : index
      %c0_21 = arith.constant 0 : index
      %31 = vector.load %arg8[%c0_19, %c0_20, %c0_21] : memref<1x4x128xf32, #tpu.memory_space<vmem>>, vector<1x4x128xf32>
      %32 = vector.shape_cast %31 : vector<1x4x128xf32> to vector<4x128xf32>
      %33 = vector.shape_cast %30 : vector<4x128xf32> to vector<1x4x128xf32>
      tpu.vector_store %arg8[%c0_19, %c0_20, %c0_21], %33 {strides = array<i32>} : memref<1x4x128xf32, #tpu.memory_space<vmem>>, vector<1x4x128xf32>,
    } else {
    }
    return
  }
  func.func @transform_0(%arg0: i32, %arg1: i32, %arg2: i32) -> (i32, i32, i32) {
    %c1_i32 = arith.constant 1 : i32
    %0 = arith.muli %arg0, %c1_i32 : i32
    %1 = arith.addi %0, %arg2 : i32
    %c0_i32 = arith.constant 0 : i32
    %c0_i32_0 = arith.constant 0 : i32
    return %arg1, %1, %c0_i32 : i32, i32, i32
  }
  func.func @transform_1(%arg0: i32, %arg1: i32, %arg2: i32) -> (i32, i32) {
    %c0_i32 = arith.constant 0 : i32
    %c0_i32_0 = arith.constant 0 : i32
    %c0_i32_1 = arith.constant 0 : i32
    return %c0_i32, %c0_i32_0 : i32, i32
  }
  func.func @transform_2(%arg0: i32, %arg1: i32, %arg2: i32) -> (i32, i32) {
    %c0_i32 = arith.constant 0 : i32
    %c0_i32_0 = arith.constant 0 : i32
    %c0_i32_1 = arith.constant 0 : i32
    return %c0_i32, %c0_i32_0 : i32, i32
  }
  func.func @transform_3(%arg0: i32, %arg1: i32, %arg2: i32) -> (i32, i32) {
    %c0_i32 = arith.constant 0 : i32
    %c0_i32_0 = arith.constant 0 : i32
    %c0_i32_1 = arith.constant 0 : i32
    return %c0_i32, %c0_i32_0 : i32, i32
  }
  func.func @transform_4(%arg0: i32, %arg1: i32, %arg2: i32) -> (i32, i32) {
    %c0_i32 = arith.constant 0 : i32
    %c0_i32_0 = arith.constant 0 : i32
    %c0_i32_1 = arith.constant 0 : i32
    return %c0_i32, %c0_i32_0 : i32, i32
  }
  func.func @transform_5(%arg0: i32, %arg1: i32, %arg2: i32) -> (i32, i32, i32) {
    %c0_i32 = arith.constant 0 : i32
    %c0_i32_0 = arith.constant 0 : i32
    return %arg0, %arg1, %c0_i32 : i32, i32, i32
  }
}

</mosaic_0001>

<bundles_post_ra>
// kernel: malconv_forward.1
= control target key start
LH: loop header
LB: loop body
LE: loop exit
PB: predicated region body
PF: predicated region fallthrough
CT: control target
= control target key end

     0   :  { %vm1116_vm0 = vcmask 1041409   ;;  %vm1118_vm1 = vcmask 1042434   ;;  %vm1120_vm2 = vcmask 1043459   ;;  %s1875_s1 = inlined_call_operand.vmem [shape: bf16[512,128], index: 1, kind: input, shape index: {}]   ;;  %s1876_s0 = inlined_call_operand.vmem [shape: bf16[4,16,1024], index: 0, kind: input, shape index: {}]   ;;  %s1877_s2 = inlined_call_operand.vmem [shape: bf16[512,128], index: 2, kind: input, shape index: {}]   ;;  %s1878_s3 = inlined_call_operand.vmem [shape: f32[1,128], index: 3, kind: input, shape index: {}]   ;;  %s1879_s4 = inlined_call_operand.vmem [shape: f32[1,128], index: 4, kind: input, shape index: {}]   ;;  %s1880_s5 = inlined_call_operand.vmem [shape: f32[1,4,128], index: 5, kind: output, shape index: {}]  }
   0x1   :  { %v1418_v0 = vld [vmem:[%s1875_s1 + $0x40] sm:$0xff]   ;;  %v1422_v4 = vld [vmem:[%s1875_s1 + $0x48] sm:$0xff]   ;;  %v1426_v8 = vld [vmem:[%s1875_s1 + $0x50] sm:$0xff]  }
   0x2   :  { %v1419_v1 = vld [vmem:[%s1875_s1 + $0xc0] sm:$0xff]   ;;  %1258 = vmatprep.subr.bf16.mxu0 %v1418_v0  ;;  %v1423_v5 = vld [vmem:[%s1875_s1 + $0xc8] sm:$0xff]   ;;  %v1427_v9 = vld [vmem:[%s1875_s1 + $0xd0] sm:$0xff]  }
   0x3   :  { %v1420_v2 = vld [vmem:[%s1875_s1] sm:$0xff]   ;;  %1298 = vmatprep.subr.bf16.mxu1 %v1419_v1  ;;  %v1424_v6 = vld [vmem:[%s1875_s1 + $0x8] sm:$0xff]   ;;  %v1428_v10 = vld [vmem:[%s1875_s1 + $0x10] sm:$0xff]  }
   0x4   :  { %v1421_v3 = vld [vmem:[%s1875_s1 + $0x80] sm:$0xff]   ;;  %1259 = vmatpush3.bf16.msra.mxu0 %v1420_v2  ;;  %v1425_v7 = vld [vmem:[%s1875_s1 + $0x88] sm:$0xff]   ;;  %v1429_v11 = vld [vmem:[%s1875_s1 + $0x90] sm:$0xff]  }
   0x5   :  { %1299 = vmatpush3.bf16.msra.mxu1 %v1421_v3  ;;  %1260 = vmatprep.subr.bf16.mxu0 %v1422_v4  ;;  %v1430_v12 = vld [vmem:[%s1875_s1 + $0x58] sm:$0xff]   ;;  %v1434_v16 = vld [vmem:[%s1875_s1 + $0x60] sm:$0xff]   ;;  %v1438_v20 = vld [vmem:[%s1875_s1 + $0x68] sm:$0xff]  }
   0x6   :  { %1300 = vmatprep.subr.bf16.mxu1 %v1423_v5  ;;  %v1431_v13 = vld [vmem:[%s1875_s1 + $0xd8] sm:$0xff]   ;;  %v1435_v17 = vld [vmem:[%s1875_s1 + $0xe0] sm:$0xff]   ;;  %v1439_v21 = vld [vmem:[%s1875_s1 + $0xe8] sm:$0xff]  }
   0x7   :  { %v1432_v14 = vld [vmem:[%s1875_s1 + $0x18] sm:$0xff]   ;;  %v1436_v18 = vld [vmem:[%s1875_s1 + $0x20] sm:$0xff]   ;;  %v1440_v22 = vld [vmem:[%s1875_s1 + $0x28] sm:$0xff]  }
   0x8   :  { %1261 = vmatpush3.bf16.msra.mxu0 %v1424_v6  ;;  %v1433_v15 = vld [vmem:[%s1875_s1 + $0x98] sm:$0xff]   ;;  %v1437_v19 = vld [vmem:[%s1875_s1 + $0xa0] sm:$0xff]   ;;  %v1441_v23 = vld [vmem:[%s1875_s1 + $0xa8] sm:$0xff]  }
   0x9   :  { %1301 = vmatpush3.bf16.msra.mxu1 %v1425_v7  ;;  %1262 = vmatprep.subr.bf16.mxu0 %v1426_v8  ;;  %v1442_v24 = vld [vmem:[%s1875_s1 + $0x70] sm:$0xff]   ;;  %v1446_v28 = vld [vmem:[%s1875_s1 + $0x78] sm:$0xff]   ;;  %v46_v32 = vld [vmem:[%s1876_s0] sm:$0xff] }
   0xa   :  { %1302 = vmatprep.subr.bf16.mxu1 %v1427_v9  ;;  %v1443_v25 = vld [vmem:[%s1875_s1 + $0xf0] sm:$0xff]   ;;  %v1447_v29 = vld [vmem:[%s1875_s1 + $0xf8] sm:$0xff]   ;;  %v50_v33 = vld [vmem:[%s1876_s0 + $0x20] sm:$0xff] }
   0xb   :  { %v1444_v26 = vld [vmem:[%s1875_s1 + $0x30] sm:$0xff]   ;;  %v1448_v30 = vld [vmem:[%s1875_s1 + $0x38] sm:$0xff]   ;;  %v47_v34 = vld [vmem:[%s1876_s0 + $0x8] sm:$0xff]  ;;  %v1153_v35 = vcombine.low %v46_v32, %v50_v33  ;;  %v1154_v36 = vcombine.high %v46_v32, %v50_v33 }
   0xc   :  { %1263 = vmatpush3.bf16.msra.mxu0 %v1428_v10  ;;  %v1445_v27 = vld [vmem:[%s1875_s1 + $0xb0] sm:$0xff]   ;;  %v1449_v31 = vld [vmem:[%s1875_s1 + $0xb8] sm:$0xff]   ;;  %v51_v37 = vld [vmem:[%s1876_s0 + $0x28] sm:$0xff] }
   0xd   :  { %1303 = vmatpush3.bf16.msra.mxu1 %v1429_v11  ;;  %1264 = vmatprep.subr.bf16.mxu0 %v1430_v12  ;;  %v1155_v38 = vcombine.low %v47_v34, %v51_v37  ;;  %v1156_v39 = vcombine.high %v47_v34, %v51_v37  ;;  %v1450_v40 = vld [vmem:[%s1877_s2 + $0x40] sm:$0xff]   ;;  %v1454_v44 = vld [vmem:[%s1877_s2 + $0x48] sm:$0xff]   ;;  %v1458_v56 = vld [vmem:[%s1877_s2 + $0x50] sm:$0xff]  }
   0xe   :  { %1304 = vmatprep.subr.bf16.mxu1 %v1431_v13  ;;  %518 = vmatprep.mubr.bf16.mxu0 %v1154_v36  ;;  %v1451_v41 = vld [vmem:[%s1877_s2 + $0xc0] sm:$0xff]   ;;  %v1455_v45 = vld [vmem:[%s1877_s2 + $0xc8] sm:$0xff]   ;;  %v1459_v57 = vld [vmem:[%s1877_s2 + $0xd0] sm:$0xff]  }
   0xf   :  { %583 = vmatprep.mubr.bf16.mxu1 %v1156_v39  ;;  %v1452_v42 = vld [vmem:[%s1877_s2] sm:$0xff]   ;;  %v1456_v46 = vld [vmem:[%s1877_s2 + $0x8] sm:$0xff]   ;;  %v1460_v58 = vld [vmem:[%s1877_s2 + $0x10] sm:$0xff]  }
  0x10   :  { %1265 = vmatpush3.bf16.msra.mxu0 %v1432_v14  ;;  %v1453_v43 = vld [vmem:[%s1877_s2 + $0x80] sm:$0xff]   ;;  %v1457_v47 = vld [vmem:[%s1877_s2 + $0x88] sm:$0xff]   ;;  %v1461_v59 = vld [vmem:[%s1877_s2 + $0x90] sm:$0xff]  }
  0x11   :  { %1305 = vmatpush3.bf16.msra.mxu1 %v1433_v15  ;;  %1266 = vmatprep.subr.bf16.mxu0 %v1434_v16  ;;  %v54_v48 = vld [vmem:[%s1876_s0 + $0x40] sm:$0xff]  ;;  %v55_v51 = vld [vmem:[%s1876_s0 + $0x48] sm:$0xff]  ;;  %v1462_v60 = vld [vmem:[%s1877_s2 + $0x58] sm:$0xff]  }
  0x12   :  { %1306 = vmatprep.subr.bf16.mxu1 %v1435_v17  ;;  %v58_v49 = vld [vmem:[%s1876_s0 + $0x60] sm:$0xff]  ;;  %v59_v52 = vld [vmem:[%s1876_s0 + $0x68] sm:$0xff]  ;;  %v1463_v61 = vld [vmem:[%s1877_s2 + $0xd8] sm:$0xff]  }
  0x13   :  { %v1158_v50 = vcombine.high %v54_v48, %v58_v49  ;;  %v1157_v53 = vcombine.low %v54_v48, %v58_v49  ;;  %v1160_v54 = vcombine.high %v55_v51, %v59_v52  ;;  %v1159_v55 = vcombine.low %v55_v51, %v59_v52  ;;  %v1464_v62 = vld [vmem:[%s1877_s2 + $0x18] sm:$0xff]   ;;  %v62_v0 = vld [vmem:[%s1876_s0 + $0x80] sm:$0xff]  ;;  %v63_v2 = vld [vmem:[%s1876_s0 + $0x88] sm:$0xff] }
  0x14   :  { %1267 = vmatpush3.bf16.msra.mxu0 %v1436_v18  ;;  %v1465_v63 = vld [vmem:[%s1877_s2 + $0x98] sm:$0xff]   ;;  %v66_v1 = vld [vmem:[%s1876_s0 + $0xa0] sm:$0xff]  ;;  %v67_v3 = vld [vmem:[%s1876_s0 + $0xa8] sm:$0xff] }
  0x15   :  { %1307 = vmatpush3.bf16.msra.mxu1 %v1437_v19  ;;  %1268 = vmatprep.subr.bf16.mxu0 %v1438_v20  ;;  %v1162_v4 = vcombine.high %v62_v0, %v66_v1  ;;  %v1164_v5 = vcombine.high %v63_v2, %v67_v3  ;;  %v1161_v6 = vcombine.low %v62_v0, %v66_v1  ;;  %v1466_v8 = vld [vmem:[%s1877_s2 + $0x60] sm:$0xff]   ;;  %v1470_v12 = vld [vmem:[%s1877_s2 + $0x68] sm:$0xff]   ;;  %v48_v32 = vld [vmem:[%s1876_s0 + $0x10] sm:$0xff] }
  0x16   :  { %1308 = vmatprep.subr.bf16.mxu1 %v1439_v21  ;;  %v1163_v7 = vcombine.low %v63_v2, %v67_v3  ;;  %v1467_v9 = vld [vmem:[%s1877_s2 + $0xe0] sm:$0xff]   ;;  %v1471_v13 = vld [vmem:[%s1877_s2 + $0xe8] sm:$0xff]   ;;  %v52_v33 = vld [vmem:[%s1876_s0 + $0x30] sm:$0xff] }
  0x17   :  { %v1468_v10 = vld [vmem:[%s1877_s2 + $0x20] sm:$0xff]   ;;  %v1472_v14 = vld [vmem:[%s1877_s2 + $0x28] sm:$0xff]   ;;  %v1202_v34 = vcombine.low %v48_v32, %v52_v33  ;;  %v49_v36 = vld [vmem:[%s1876_s0 + $0x18] sm:$0xff] }
  0x18   :  { %1269 = vmatpush3.bf16.msra.mxu0 %v1440_v22  ;;  %v1469_v11 = vld [vmem:[%s1877_s2 + $0xa0] sm:$0xff]   ;;  %v1473_v15 = vld [vmem:[%s1877_s2 + $0xa8] sm:$0xff]   ;;  %v53_v37 = vld [vmem:[%s1876_s0 + $0x38] sm:$0xff] }
  0x19   :  { %1309 = vmatpush3.bf16.msra.mxu1 %v1441_v23  ;;  %1270 = vmatprep.subr.bf16.mxu0 %v1442_v24  ;;  %v70_v16 = vld [vmem:[%s1876_s0 + $0xc0] sm:$0xff]  ;;  %v71_v18 = vld [vmem:[%s1876_s0 + $0xc8] sm:$0xff]  ;;  %v1474_v24 = vld [vmem:[%s1877_s2 + $0x70] sm:$0xff]   ;;  %v1204_v39 = vcombine.low %v49_v36, %v53_v37 }
  0x1a   :  { %1310 = vmatprep.subr.bf16.mxu1 %v1443_v25  ;;  %v74_v17 = vld [vmem:[%s1876_s0 + $0xe0] sm:$0xff]  ;;  %v75_v20 = vld [vmem:[%s1876_s0 + $0xe8] sm:$0xff]  ;;  %v1475_v25 = vld [vmem:[%s1877_s2 + $0xf0] sm:$0xff]  }
  0x1b   :  { %v1166_v19 = vcombine.high %v70_v16, %v74_v17  ;;  %v1165_v21 = vcombine.low %v70_v16, %v74_v17  ;;  %v1168_v22 = vcombine.high %v71_v18, %v75_v20  ;;  %v1167_v23 = vcombine.low %v71_v18, %v75_v20  ;;  %v65_v48 = vld [vmem:[%s1876_s0 + $0x98] sm:$0xff]  ;;  %v1152_v2 = vld [vmem:[%s1878_s3] ss:$0 sm:$0xff] }
  0x1c   :  { %1271 = vmatpush3.bf16.msra.mxu0 %v1444_v26  ;;  %v1476_v26 = vld [vmem:[%s1877_s2 + $0x30] sm:$0xff]   ;;  %v69_v49 = vld [vmem:[%s1876_s0 + $0xb8] sm:$0xff] }
  0x1d   :  { %1311 = vmatpush3.bf16.msra.mxu1 %v1445_v27  ;;  %1272 = vmatprep.subr.bf16.mxu0 %v1446_v28  ;;  %v1477_v27 = vld [vmem:[%s1877_s2 + $0xb0] sm:$0xff]   ;;  %v1478_v28 = vld [vmem:[%s1877_s2 + $0x78] sm:$0xff]  }
  0x1e   :  { %1312 = vmatprep.subr.bf16.mxu1 %v1447_v29  ;;  %v1479_v29 = vld [vmem:[%s1877_s2 + $0xf8] sm:$0xff]  }
  0x20   :  { %1273 = vmatpush3.bf16.msra.mxu0 %v1448_v30  ;;  %v1480_v30 = vld [vmem:[%s1877_s2 + $0x38] sm:$0xff]  }
  0x21   :  { %1313 = vmatpush3.bf16.msra.mxu1 %v1449_v31  ;;  %1338 = vmatprep.subr.bf16.mxu0 %v1450_v40  ;;  %v1481_v31 = vld [vmem:[%s1877_s2 + $0xb8] sm:$0xff]   ;;  %v1205_v40 = vcombine.high %v49_v36, %v53_v37 }
  0x22   :  { %1378 = vmatprep.subr.bf16.mxu1 %v1451_v41  ;;  %v60_v41 = vld [vmem:[%s1876_s0 + $0x70] sm:$0xff] }
  0x23   :  { %519 = vmatmul.mubr.bf16.vlgmr.msra.gmra.mrb[0].mxu0 %v1153_v35  ;;  %v1203_v35 = vcombine.high %v48_v32, %v52_v33 }
  0x24   :  { %584 = vmatmul.mubr.bf16.vlgmr.msra.gmra.mrb[0].mxu1 %v1155_v38  ;;  %1339 = vmatpush3.bf16.msra.mxu0 %v1452_v42  ;;  %v56_v38 = vld [vmem:[%s1876_s0 + $0x50] sm:$0xff]  ;;  %v57_v42 = vld [vmem:[%s1876_s0 + $0x58] sm:$0xff] }
  0x25   :  { %1379 = vmatpush3.bf16.msra.mxu1 %v1453_v43  ;;  %1340 = vmatprep.subr.bf16.mxu0 %v1454_v44  ;;  %v61_v43 = vld [vmem:[%s1876_s0 + $0x78] sm:$0xff]  ;;  %v1207_v44 = vcombine.high %v56_v38, %v60_v41 }
  0x26   :  { %1380 = vmatprep.subr.bf16.mxu1 %v1455_v45  ;;  %526 = vmatprep.mubr.bf16.mxu0 %v1158_v50  ;;  %v1209_v45 = vcombine.high %v57_v42, %v61_v43  ;;  %v1206_v50 = vcombine.low %v56_v38, %v60_v41  ;;  %v1208_v51 = vcombine.low %v57_v42, %v61_v43 }
  0x27   :  { %591 = vmatprep.mubr.bf16.mxu1 %v1160_v54  ;;  %v72_v54 = vld [vmem:[%s1876_s0 + $0xd0] sm:$0xff] }
  0x28   :  { %1341 = vmatpush3.bf16.msra.mxu0 %v1456_v46  ;;  %v64_v46 = vld [vmem:[%s1876_s0 + $0x90] sm:$0xff] }
  0x29   :  { %1381 = vmatpush3.bf16.msra.mxu1 %v1457_v47  ;;  %1342 = vmatprep.subr.bf16.mxu0 %v1458_v56  ;;  %v68_v47 = vld [vmem:[%s1876_s0 + $0xb0] sm:$0xff]  ;;  %v73_v56 = vld [vmem:[%s1876_s0 + $0xd8] sm:$0xff] }
  0x2a   :  { %1382 = vmatprep.subr.bf16.mxu1 %v1459_v57  ;;  %v1211_v52 = vcombine.high %v64_v46, %v68_v47  ;;  %v77_v57 = vld [vmem:[%s1876_s0 + $0xf8] sm:$0xff] }
  0x2b   :  { %527 = vmatmul.mubr.bf16.gmra.mrb[4].mxu0 %v1157_v53  ;;  %v1213_v53 = vcombine.high %v65_v48, %v69_v49 }
  0x2c   :  { %592 = vmatmul.mubr.bf16.gmra.mrb[4].mxu1 %v1159_v55  ;;  %1343 = vmatpush3.bf16.msra.mxu0 %v1460_v58  ;;  %v76_v55 = vld [vmem:[%s1876_s0 + $0xf0] sm:$0xff]  ;;  %v1210_v58 = vcombine.low %v64_v46, %v68_v47 }
  0x2d   :  { %1383 = vmatpush3.bf16.msra.mxu1 %v1461_v59  ;;  %1344 = vmatprep.subr.bf16.mxu0 %v1462_v60  ;;  %v1212_v59 = vcombine.low %v65_v48, %v69_v49  ;;  %v1215_v60 = vcombine.high %v72_v54, %v76_v55 }
  0x2e   :  { %1384 = vmatprep.subr.bf16.mxu1 %v1463_v61  ;;  %534 = vmatprep.mubr.bf16.mxu0 %v1162_v4  ;;  %v1217_v61 = vcombine.high %v73_v56, %v77_v57 }
  0x2f   :  { %599 = vmatprep.mubr.bf16.mxu1 %v1164_v5 }
  0x30   :  { %1345 = vmatpush3.bf16.msra.mxu0 %v1464_v62  ;;  %v1214_v62 = vcombine.low %v72_v54, %v76_v55 }
  0x31   :  { %1385 = vmatpush3.bf16.msra.mxu1 %v1465_v63  ;;  %1346 = vmatprep.subr.bf16.mxu0 %v1466_v8  ;;  %v1216_v63 = vcombine.low %v73_v56, %v77_v57 }
  0x32   :  { %1386 = vmatprep.subr.bf16.mxu1 %v1467_v9 }
  0x33   :  { %535 = vmatmul.mubr.bf16.gmra.mrb[8].mxu0 %v1161_v6 }
  0x34   :  { %600 = vmatmul.mubr.bf16.gmra.mrb[8].mxu1 %v1163_v7  ;;  %1347 = vmatpush3.bf16.msra.mxu0 %v1468_v10 }
  0x35   :  { %1387 = vmatpush3.bf16.msra.mxu1 %v1469_v11  ;;  %1348 = vmatprep.subr.bf16.mxu0 %v1470_v12 }
  0x36   :  { %1388 = vmatprep.subr.bf16.mxu1 %v1471_v13  ;;  %542 = vmatprep.mubr.bf16.mxu0 %v1166_v19 }
  0x37   :  { %607 = vmatprep.mubr.bf16.mxu1 %v1168_v22 }
  0x38   :  { %1349 = vmatpush3.bf16.msra.mxu0 %v1472_v14 }
  0x39   :  { %1389 = vmatpush3.bf16.msra.mxu1 %v1473_v15  ;;  %1350 = vmatprep.subr.bf16.mxu0 %v1474_v24 }
  0x3a   :  { %1390 = vmatprep.subr.bf16.mxu1 %v1475_v25 }
  0x3b   :  { %543 = vmatmul.mubr.bf16.gmra.mrb[12].mxu0 %v1165_v21 }
  0x3c   :  { %608 = vmatmul.mubr.bf16.gmra.mrb[12].mxu1 %v1167_v23  ;;  %1351 = vmatpush3.bf16.msra.mxu0 %v1476_v26 }
  0x3d   :  { %1391 = vmatpush3.bf16.msra.mxu1 %v1477_v27  ;;  %1352 = vmatprep.subr.bf16.mxu0 %v1478_v28 }
  0x3e   :  { %1392 = vmatprep.subr.bf16.mxu1 %v1479_v29  ;;  %926 = vmatprep.mubr.bf16.mxu0 %v1203_v35 }
  0x3f   :  { %991 = vmatprep.mubr.bf16.mxu1 %v1205_v40 }
  0x40   :  { %1353 = vmatpush3.bf16.msra.mxu0 %v1480_v30 }
  0x41   :  { %1393 = vmatpush3.bf16.msra.mxu1 %v1481_v31 }
  0x43   :  { %927 = vmatmul.mubr.bf16.vlgmr.msra.gmra.mrb[16].mxu0 %v1202_v34 }
  0x44   :  { %992 = vmatmul.mubr.bf16.vlgmr.msra.gmra.mrb[16].mxu1 %v1204_v39  ;;  %934 = vmatprep.mubr.bf16.mxu0 %v1207_v44 }
  0x45   :  { %999 = vmatprep.mubr.bf16.mxu1 %v1209_v45 }
  0x4b   :  { %935 = vmatmul.mubr.bf16.gmra.mrb[20].mxu0 %v1206_v50 }
  0x4c   :  { %1000 = vmatmul.mubr.bf16.gmra.mrb[20].mxu1 %v1208_v51  ;;  %942 = vmatprep.mubr.bf16.mxu0 %v1211_v52 }
  0x4d   :  { %1007 = vmatprep.mubr.bf16.mxu1 %v1213_v53 }
  0x53   :  { %943 = vmatmul.mubr.bf16.gmra.mrb[24].mxu0 %v1210_v58 }
  0x54   :  { %1008 = vmatmul.mubr.bf16.gmra.mrb[24].mxu1 %v1212_v59  ;;  %950 = vmatprep.mubr.bf16.mxu0 %v1215_v60 }
  0x55   :  { %1015 = vmatprep.mubr.bf16.mxu1 %v1217_v61 }
  0x5b   :  { %951 = vmatmul.mubr.bf16.gmra.mrb[28].mxu0 %v1214_v62 }
  0x5c   :  { %1016 = vmatmul.mubr.bf16.gmra.mrb[28].mxu1 %v1216_v63 }
  0xf6   :  { %v1274_v0 = vpop.f32.mrb[0].mxu0 }
  0xf7   :  { %v1314_v1 = vpop.f32.mrb[0].mxu1  ;;  %v1275_v3 = vpop.f32.mrb[1].mxu0 }
  0xf8   :  { %v1276_v4 = vadd.f32 %v1275_v3, %v1274_v0  ;;  %v1315_v5 = vpop.f32.mrb[1].mxu1  ;;  %v1277_v6 = vpop.f32.mrb[2].mxu0 }
  0xf9   :  { %v1316_v7 = vadd.f32 %v1315_v5, %v1314_v1  ;;  %v1317_v8 = vpop.f32.mrb[2].mxu1  ;;  %v1278_v9 = vpop.f32.mrb[3].mxu0 }
  0xfa   :  { %v521_v10 = vadd.f32 %v1276_v4, %v1152_v2  ;;  %v1279_v11 = vadd.f32 %v1278_v9, %v1277_v6  ;;  %v1318_v12 = vpop.f32.mrb[3].mxu1  ;;  %v1854_v4 = vld [vmem:[%s1879_s4] ss:$0 sm:$0xff] }
  0xfb   :  { %v1319_v13 = vadd.f32 %v1318_v12, %v1317_v8 }
  0xfc   :  { %v1835_v14 = vadd.f32 %v1316_v7, %v521_v10  ;;  %v524_v15 = vadd.f32 %v1279_v11, %v1152_v2 }
  0xfe   :  { %v1837_v16 = vadd.f32 %v1319_v13, %v524_v15  ;;  %v1280_v17 = vpop.f32.mrb[4].mxu0 }
  0xff   :  { %v1320_v18 = vpop.f32.mrb[4].mxu1  ;;  %v1281_v19 = vpop.f32.mrb[5].mxu0 }
 0x100   :  { %v1282_v20 = vadd.f32 %v1281_v19, %v1280_v17  ;;  %v1321_v21 = vpop.f32.mrb[5].mxu1  ;;  %v1283_v22 = vpop.f32.mrb[6].mxu0 }
 0x101   :  { %v1322_v23 = vadd.f32 %v1321_v21, %v1320_v18  ;;  %v1323_v24 = vpop.f32.mrb[6].mxu1  ;;  %v1284_v25 = vpop.f32.mrb[7].mxu0 }
 0x102   :  { %v529_v26 = vadd.f32 %v1282_v20, %v1152_v2  ;;  %v1285_v27 = vadd.f32 %v1284_v25, %v1283_v22  ;;  %v1324_v28 = vpop.f32.mrb[7].mxu1 }
 0x103   :  { %v1325_v29 = vadd.f32 %v1324_v28, %v1323_v24 }
 0x104   :  { %v1839_v30 = vadd.f32 %v1322_v23, %v529_v26  ;;  %v532_v31 = vadd.f32 %v1285_v27, %v1152_v2 }
 0x106   :  { %v1841_v32 = vadd.f32 %v1325_v29, %v532_v31  ;;  %v1286_v33 = vpop.f32.mrb[8].mxu0 }
 0x107   :  { %v1326_v34 = vpop.f32.mrb[8].mxu1  ;;  %v1287_v35 = vpop.f32.mrb[9].mxu0 }
 0x108   :  { %v1327_v36 = vpop.f32.mrb[9].mxu1  ;;  %v1288_v37 = vadd.f32 %v1287_v35, %v1286_v33  ;;  %v1289_v39 = vpop.f32.mrb[10].mxu0 }
 0x109   :  { %v1328_v38 = vadd.f32 %v1327_v36, %v1326_v34  ;;  %v1329_v40 = vpop.f32.mrb[10].mxu1  ;;  %v1290_v41 = vpop.f32.mrb[11].mxu0 }
 0x10a   :  { %v1330_v42 = vpop.f32.mrb[11].mxu1  ;;  %v537_v43 = vadd.f32 %v1288_v37, %v1152_v2  ;;  %v1291_v44 = vadd.f32 %v1290_v41, %v1289_v39 }
 0x10b   :  { %v1331_v45 = vadd.f32 %v1330_v42, %v1329_v40 }
 0x10c   :  { %v1843_v46 = vadd.f32 %v1328_v38, %v537_v43  ;;  %v540_v47 = vadd.f32 %v1291_v44, %v1152_v2 }
 0x10e   :  { %v1845_v48 = vadd.f32 %v1331_v45, %v540_v47  ;;  %v1292_v49 = vpop.f32.mrb[12].mxu0 }
 0x10f   :  { %v1332_v50 = vpop.f32.mrb[12].mxu1  ;;  %v1293_v51 = vpop.f32.mrb[13].mxu0 }
 0x110   :  { %v1294_v52 = vadd.f32 %v1293_v51, %v1292_v49  ;;  %v1333_v53 = vpop.f32.mrb[13].mxu1  ;;  %v1295_v54 = vpop.f32.mrb[14].mxu0 }
 0x111   :  { %v1334_v55 = vadd.f32 %v1333_v53, %v1332_v50  ;;  %v1335_v56 = vpop.f32.mrb[14].mxu1  ;;  %v1296_v57 = vpop.f32.mrb[15].mxu0 }
 0x112   :  { %v545_v58 = vadd.f32 %v1294_v52, %v1152_v2  ;;  %v1297_v59 = vadd.f32 %v1296_v57, %v1295_v54  ;;  %v1336_v60 = vpop.f32.mrb[15].mxu1 }
 0x113   :  { %v1337_v61 = vadd.f32 %v1336_v60, %v1335_v56 }
 0x114   :  { %v1847_v62 = vadd.f32 %v1334_v55, %v545_v58  ;;  %v548_v63 = vadd.f32 %v1297_v59, %v1152_v2 }
 0x116   :  { %v1849_v0 = vadd.f32 %v1337_v61, %v548_v63  ;;  %v1354_v1 = vpop.f32.mrb[16].mxu0 }
 0x117   :  { %v1394_v3 = vpop.f32.mrb[16].mxu1  ;;  %v1355_v5 = vpop.f32.mrb[17].mxu0 }
 0x118   :  { %v1356_v6 = vadd.f32 %v1355_v5, %v1354_v1  ;;  %v1395_v7 = vpop.f32.mrb[17].mxu1  ;;  %v1357_v8 = vpop.f32.mrb[18].mxu0 }
 0x119   :  { %v1396_v9 = vadd.f32 %v1395_v7, %v1394_v3  ;;  %v1397_v10 = vpop.f32.mrb[18].mxu1  ;;  %v1358_v11 = vpop.f32.mrb[19].mxu0 }
 0x11a   :  { %v929_v12 = vadd.f32 %v1356_v6, %v1854_v4  ;;  %v1359_v13 = vadd.f32 %v1358_v11, %v1357_v8  ;;  %v1398_v2 = vpop.f32.mrb[19].mxu1 }
 0x11b   :  { %v1399_v15 = vadd.f32 %v1398_v2, %v1397_v10 }
 0x11c   :  { %v994_v17 = vadd.f32 %v1396_v9, %v929_v12  ;;  %v932_v18 = vadd.f32 %v1359_v13, %v1854_v4 }
 0x11e   :  { %v1250_v19 = vmul.f32 -1.442695, %v994_v17  ;;  %v997_v20 = vadd.f32 %v1399_v15, %v932_v18  ;;  %v1360_v21 = vpop.f32.mrb[20].mxu0 }
 0x11f   :  { %v1400_v22 = vpop.f32.mrb[20].mxu1  ;;  %v1361_v23 = vpop.f32.mrb[21].mxu0 }
 0x120   :  { %1482 = vpow2.f32 %v1250_v19  ;;  %v1251_v24 = vmul.f32 -1.442695, %v997_v20  ;;  %v1362_v25 = vadd.f32 %v1361_v23, %v1360_v21  ;;  %v1401_v26 = vpop.f32.mrb[21].mxu1  ;;  %v1363_v27 = vpop.f32.mrb[22].mxu0 }
 0x121   :  { %v1402_v28 = vadd.f32 %v1401_v26, %v1400_v22  ;;  %v1403_v29 = vpop.f32.mrb[22].mxu1  ;;  %v1364_v31 = vpop.f32.mrb[23].mxu0 }
 0x122   :  { %1484 = vpow2.f32 %v1251_v24  ;;  %v937_v33 = vadd.f32 %v1362_v25, %v1854_v4  ;;  %v1365_v34 = vadd.f32 %v1364_v31, %v1363_v27  ;;  %v1404_v35 = vpop.f32.mrb[23].mxu1 }
 0x123   :  { %v1405_v36 = vadd.f32 %v1404_v35, %v1403_v29 }
 0x124   :  { %v1002_v37 = vadd.f32 %v1402_v28, %v937_v33  ;;  %v940_v38 = vadd.f32 %v1365_v34, %v1854_v4 }
 0x126   :  { %v1252_v39 = vmul.f32 -1.442695, %v1002_v37  ;;  %v1005_v40 = vadd.f32 %v1405_v36, %v940_v38  ;;  %v1366_v41 = vpop.f32.mrb[24].mxu0 }
 0x127   :  { %v1406_v42 = vpop.f32.mrb[24].mxu1  ;;  %v1367_v43 = vpop.f32.mrb[25].mxu0 }
 0x128   :  { %1486 = vpow2.f32 %v1252_v39  ;;  %v1253_v44 = vmul.f32 -1.442695, %v1005_v40  ;;  %v1368_v45 = vadd.f32 %v1367_v43, %v1366_v41  ;;  %v1407_v47 = vpop.f32.mrb[25].mxu1  ;;  %v1369_v49 = vpop.f32.mrb[26].mxu0 }
 0x129   :  { %v1408_v50 = vadd.f32 %v1407_v47, %v1406_v42  ;;  %v1409_v51 = vpop.f32.mrb[26].mxu1  ;;  %v1370_v52 = vpop.f32.mrb[27].mxu0 }
 0x12a   :  { %v1483_v53 = vpop.eup %1482  ;;  %1488 = vpow2.f32 %v1253_v44  ;;  %v945_v54 = vadd.f32 %v1368_v45, %v1854_v4  ;;  %v1371_v55 = vadd.f32 %v1370_v52, %v1369_v49  ;;  %v1410_v56 = vpop.f32.mrb[27].mxu1 }
 0x12b   :  { %v1048_v57 = vadd.f32 1.0, %v1483_v53  ;;  %v1411_v58 = vadd.f32 %v1410_v56, %v1409_v51 }
 0x12c   :  { %v1485_v59 = vpop.eup %1484  ;;  %v1010_v60 = vadd.f32 %v1408_v50, %v945_v54  ;;  %v948_v61 = vadd.f32 %v1371_v55, %v1854_v4 }
 0x12d   :  { %1490 = vrcp.f32 %v1048_v57  ;;  %v1049_v63 = vadd.f32 1.0, %v1485_v59 }
 0x12e   :  { %v1254_v1 = vmul.f32 -1.442695, %v1010_v60  ;;  %v1013_v3 = vadd.f32 %v1411_v58, %v948_v61  ;;  %v1372_v5 = vpop.f32.mrb[28].mxu0 }
 0x12f   :  { %1492 = vrcp.f32 %v1049_v63  ;;  %v1412_v6 = vpop.f32.mrb[28].mxu1  ;;  %v1373_v7 = vpop.f32.mrb[29].mxu0 }
 0x130   :  { %1494 = vpow2.f32 %v1254_v1  ;;  %v1255_v8 = vmul.f32 -1.442695, %v1013_v3  ;;  %v1374_v9 = vadd.f32 %v1373_v7, %v1372_v5  ;;  %v1413_v10 = vpop.f32.mrb[29].mxu1  ;;  %v1375_v11 = vpop.f32.mrb[30].mxu0 }
 0x131   :  { %v1414_v12 = vadd.f32 %v1413_v10, %v1412_v6  ;;  %v1415_v13 = vpop.f32.mrb[30].mxu1  ;;  %v1376_v2 = vpop.f32.mrb[31].mxu0 }
 0x132   :  { %v1487_v15 = vpop.eup %1486  ;;  %1496 = vpow2.f32 %v1255_v8  ;;  %v953_v17 = vadd.f32 %v1374_v9, %v1854_v4  ;;  %v1377_v18 = vadd.f32 %v1376_v2, %v1375_v11  ;;  %v1416_v19 = vpop.f32.mrb[31].mxu1 }
 0x133   :  { %v1050_v20 = vadd.f32 1.0, %v1487_v15  ;;  %v1417_v21 = vadd.f32 %v1416_v19, %v1415_v13 }
 0x134   :  { %v1489_v22 = vpop.eup %1488  ;;  %v1018_v23 = vadd.f32 %v1414_v12, %v953_v17  ;;  %v956_v24 = vadd.f32 %v1377_v18, %v1854_v4 }
 0x135   :  { %1498 = vrcp.f32 %v1050_v20  ;;  %v1051_v25 = vadd.f32 1.0, %v1489_v22 }
 0x136   :  { %v1256_v26 = vmul.f32 -1.442695, %v1018_v23  ;;  %v1021_v27 = vadd.f32 %v1417_v21, %v956_v24 }
 0x137   :  { %v1491_v28 = vpop.eup %1490  ;;  %1500 = vrcp.f32 %v1051_v25 }
 0x138   :  { %v1072_v29 = vmul.f32 %v1491_v28, %v1835_v14  ;;  %1502 = vpow2.f32 %v1256_v26  ;;  %v1257_v31 = vmul.f32 -1.442695, %v1021_v27 }
 0x139   :  { %v1493_v33 = vpop.eup %1492 }
 0x13a   :  { %v1495_v34 = vpop.eup %1494  ;;  %v1073_v35 = vmul.f32 %v1493_v33, %v1837_v16  ;;  %1504 = vpow2.f32 %v1257_v31 }
 0x13b   :  { %v1052_v36 = vadd.f32 1.0, %v1495_v34 }
 0x13c   :  { %v1497_v37 = vpop.eup %1496  ;;  %v1080_v38 = vmax.f32 %v1072_v29, %v1073_v35 }
 0x13d   :  { %1506 = vrcp.f32 %v1052_v36  ;;  %v1053_v4 = vadd.f32 1.0, %v1497_v37 }
 0x13e   :  { %v1081_v39 = vrot.slane %v1080_v38, 4 }
 0x13f   :  { %v1499_v40 = vpop.eup %1498  ;;  %1508 = vrcp.f32 %v1053_v4 }
 0x140   :  { %v1082_v41 = vmax.f32 %v1080_v38, %v1081_v39  ;;  %v1074_v42 = vmul.f32 %v1499_v40, %v1839_v30 }
 0x141   :  { %v1501_v43 = vpop.eup %1500 }
 0x142   :  { %v1503_v14 = vpop.eup %1502  ;;  %v1075_v44 = vmul.f32 %v1501_v43, %v1841_v32  ;;  %v1083_v49 = vrot.slane %v1082_v41, 2 }
 0x143   :  { %v1054_v45 = vadd.f32 1.0, %v1503_v14 }
 0x144   :  { %v1505_v47 = vpop.eup %1504  ;;  %v1087_v16 = vmax.f32 %v1074_v42, %v1075_v44  ;;  %v1084_v53 = vmax.f32 %v1082_v41, %v1083_v49 }
 0x145   :  { %1510 = vrcp.f32 %v1054_v45  ;;  %v1055_v50 = vadd.f32 1.0, %v1505_v47 }
 0x146   :  { %v1088_v51 = vrot.slane %v1087_v16, 4  ;;  %v1085_v58 = vrot.slane %v1084_v53, 1 }
 0x147   :  { %v1507_v52 = vpop.eup %1506  ;;  %1512 = vrcp.f32 %v1055_v50 }
 0x148   :  { %v1089_v54 = vmax.f32 %v1087_v16, %v1088_v51  ;;  %v1076_v55 = vmul.f32 %v1507_v52, %v1843_v46  ;;  %v1086_v1 = vmax.f32 %v1084_v53, %v1085_v58 }
 0x149   :  { %v1509_v56 = vpop.eup %1508 }
 0x14a   :  { %v1090_v57 = vrot.slane %v1089_v54, 2  ;;  %v1077_v30 = vmul.f32 %v1509_v56, %v1845_v48 }
 0x14c   :  { %v1091_v59 = vmax.f32 %v1089_v54, %v1090_v57  ;;  %v1094_v32 = vmax.f32 %v1076_v55, %v1077_v30 }
 0x14e   :  { %v1092_v60 = vrot.slane %v1091_v59, 1  ;;  %v1095_v61 = vrot.slane %v1094_v32, 4 }
 0x14f   :  { %v1511_v63 = vpop.eup %1510 }
 0x150   :  { %v1093_v3 = vmax.f32 %v1091_v59, %v1092_v60  ;;  %v1096_v5 = vmax.f32 %v1094_v32, %v1095_v61  ;;  %v1078_v6 = vmul.f32 %v1511_v63, %v1847_v62 }
 0x151   :  { %v1513_v7 = vpop.eup %1512 }
 0x152   :  { %v1117_v8 = vsel %vm1116_vm0, %v1093_v3, %v1086_v1  ;;  %v1097_v9 = vrot.slane %v1096_v5, 2  ;;  %v1079_v46 = vmul.f32 %v1513_v7, %v1849_v0 }
 0x154   :  { %v1098_v10 = vmax.f32 %v1096_v5, %v1097_v9  ;;  %v1101_v11 = vmax.f32 %v1078_v6, %v1079_v46 }
 0x156   :  { %v1099_v48 = vrot.slane %v1098_v10, 1  ;;  %v1102_v12 = vrot.slane %v1101_v11, 4 }
 0x158   :  { %v1100_v13 = vmax.f32 %v1098_v10, %v1099_v48  ;;  %v1103_v2 = vmax.f32 %v1101_v11, %v1102_v12 }
 0x15a   :  { %v1119_v15 = vsel %vm1118_vm1, %v1100_v13, %v1117_v8  ;;  %v1104_v17 = vrot.slane %v1103_v2, 2 }
 0x15c   :  { %v1105_v18 = vmax.f32 %v1103_v2, %v1104_v17 }
 0x15e   :  { %v1106_v19 = vrot.slane %v1105_v18, 1 }
 0x160   :  { %v1107_v20 = vmax.f32 %v1105_v18, %v1106_v19 }
 0x162   :  { %v1121_v21 = vsel %vm1120_vm2, %v1107_v20, %v1119_v15 }
 0x163   :  { %1123 = vst [vmem:[%s1880_s5] sm:$0xf] %v1121_v21 }

</bundles_post_ra>
